<compile_context>
chip_gen: v7x
topology: tpu7x:2x2x1
jax: 0.10.0
libtpu: 0.0.40
codegen_flags: <defaults>
</compile_context>

<pallas_src>
import functools

import jax
import jax.numpy as jnp
from jax.experimental import pallas as pl
from jax.experimental.pallas import tpu as pltpu

_MAX_ROW_TILE = 2048           # hard cap on sublane tile (multiple of 32)
_TARGET_STEP_BYTES = 8 << 20   # aim ~8 MiB of (in + out) bytes per grid step
_TARGET_STEPS = 8              # desired minimum grid steps (pipelining / v7x)
_MAX_COLS = 4096               # widest lane extent considered
_PREF_COLS = 1024              # preferred lane width among exact divisors
_PAD_LANE = 128                # lane width for the rare pad fallback
_PALLAS_MIN_ELEMS = 1 << 16    # below this, a fused jnp cast beats launch cost
_VMEM_LIMIT = 32 * 1024 * 1024


def _round_up(x, m):
    return ((x + m - 1) // m) * m


def _cast_scale_kernel(x_ref, o_ref, *, mul):
    x = x_ref[...]
    if mul != 1.0:
        # Scaled conversion needs an f32 intermediate for the multiply.
        x = x.astype(jnp.float32) * jnp.float32(mul)
    o_ref[...] = x.astype(o_ref.dtype)


def _scale_factor(in_dtype, out_dtype):
    """Mirror torchvision F.convert_image_dtype scaling factors."""
    in_dt = jnp.dtype(in_dtype)
    out_dt = jnp.dtype(out_dtype)
    in_is_float = jnp.issubdtype(in_dt, jnp.floating)
    out_is_float = jnp.issubdtype(out_dt, jnp.floating)

    if in_is_float and out_is_float:
        return 1.0
    if (not in_is_float) and out_is_float:
        return 1.0 / float(jnp.iinfo(in_dt).max)
    if in_is_float and not out_is_float:
        eps = 1e-3
        return float(jnp.iinfo(out_dt).max) + 1.0 - eps
    # TODO(synk): int -> int scaled conversion (bit-shift based in torchvision)
    # is not implemented; plain cast is used instead.
    return 1.0


def _choose_cols(total):
    """Pick a divisor of `total` to use as the (lane) last dim — pad-free view.

    Prefers exact multiples of 128 (perfect lane utilization); otherwise takes
    a full-extent last dim with >=85% lane utilization.  Returns None if no
    acceptable divisor exists (caller pads).
    """
    exact, approx = [], []
    upper = min(_MAX_COLS, total)
    for d in range(128, upper + 1):
        if total % d:
            continue
        if d % 128 == 0:
            exact.append(d)
        else:
            util = d / _round_up(d, 128)
            if util >= 0.85:
                approx.append((util, d))
    if exact:
        small = [d for d in exact if d <= _PREF_COLS]
        return max(small) if small else min(exact)
    if approx:
        return max(approx)[1]
    return None


def _choose_row_tile(rows, cols, bytes_per_elem):
    """Row tile: multiple of 32, ~8 MiB/step cap, >= _TARGET_STEPS steps."""
    if rows <= 32:
        return rows  # single full-extent block (always layout-legal)
    tr_bytes = max(32, (_TARGET_STEP_BYTES // (cols * bytes_per_elem)) // 32 * 32)
    tr_steps = max(32, _round_up(pl.cdiv(rows, _TARGET_STEPS), 32))
    tr = min(tr_bytes, tr_steps, _MAX_ROW_TILE, (rows // 32) * 32)
    return max(32, tr)


def _run_cast_pallas(image, out_dtype, mul):
    """Tiled, pipelined elementwise cast on a lane-dense (rows, cols) view."""
    orig_shape = image.shape
    total = int(image.size)
    out_dt = jnp.dtype(out_dtype)
    in_dt = jnp.dtype(image.dtype)

    cols = _choose_cols(total)
    padded = cols is None
    if padded:
        # TODO(synk): shapes with no usable divisor (e.g. prime element count)
        # pay one extra HBM copy for pad + slice; an in-kernel ragged-tail path
        # via manual DMA could remove it but isn't worth it for a pure cast.
        cols = _PAD_LANE
        flat = image.reshape(total)
        pad = (-total) % cols
        if pad:
            flat = jnp.pad(flat, (0, pad))
        rows = flat.shape[0] // cols
        x2d = flat.reshape(rows, cols)
    else:
        rows = total // cols
        x2d = image.reshape(rows, cols)  # contiguous -> no-copy reshape

    bpe = in_dt.itemsize + out_dt.itemsize
    tr = _choose_row_tile(rows, cols, bpe)
    grid = (pl.cdiv(rows, tr),)

    kernel = functools.partial(_cast_scale_kernel, mul=mul)
    out2d = pl.pallas_call(
        kernel,
        out_shape=jax.ShapeDtypeStruct((rows, cols), out_dt),
        grid=grid,
        in_specs=[pl.BlockSpec((tr, cols), lambda i: (i, 0))],
        out_specs=pl.BlockSpec((tr, cols), lambda i: (i, 0)),
        compiler_params=pltpu.CompilerParams(
            dimension_semantics=("parallel",),
            vmem_limit_bytes=_VMEM_LIMIT),
        cost_estimate=pl.CostEstimate(
            flops=total if mul != 1.0 else 0,
            transcendentals=0,
            bytes_accessed=total * bpe),
    )(x2d)

    if padded:
        out = out2d.reshape(rows * cols)[:total]
    else:
        out = out2d
    return out.reshape(orig_shape)


def _jnp_cast(image, out_dtype, mul):
    if mul != 1.0:
        return (image.astype(jnp.float32) * jnp.float32(mul)).astype(out_dtype)
    return image.astype(out_dtype)


class ToDtype:
    """JAX/Pallas port of the PyTorch ToDtype transform."""

    def __init__(self, dtype, scale: bool = False, use_pallas=None):
        self.dtype = jnp.dtype(dtype)
        self.scale = bool(scale)
        self.use_pallas = use_pallas  # None -> auto size heuristic

    def __call__(self, image, target=None):
        mul = _scale_factor(image.dtype, self.dtype) if self.scale else 1.0

        # Identity conversion: no scaling, dtype already matches -> no HBM trip.
        if mul == 1.0 and jnp.dtype(image.dtype) == self.dtype:
            return (image, target)

        use_pallas = self.use_pallas
        if use_pallas is None:
            use_pallas = int(image.size) >= _PALLAS_MIN_ELEMS

        if use_pallas:
            out = _run_cast_pallas(image, self.dtype, mul)
        else:
            # Tiny tensors: pallas_call launch overhead dwarfs the work; a plain
            # astype also lets XLA fuse it with producer/consumer inside a jit.
            out = _jnp_cast(image, self.dtype, mul)
        return (out, target)


if __name__ == "__main__":
    root = jax.random.PRNGKey(0)
    k0, k1, k2 = jax.random.split(root, 3)

    # NCHW uint8 image, small shapes: batch=2, channels=4, spatial=16.
    x_u8 = jax.random.randint(k0, (2, 4, 16, 16), 0, 256, dtype=jnp.int32).astype(
        jnp.uint8
    )
    ref_f32 = x_u8.astype(jnp.float32) / 255.0

    # Case 1: scaled conversion uint8 -> float32 (divide by 255) via Pallas.
    out_f32, tgt = ToDtype(jnp.float32, scale=True, use_pallas=True)(x_u8, target=None)
    out_f32 = jax.block_until_ready(out_f32)
    assert out_f32.shape == (2, 4, 16, 16) and out_f32.dtype == jnp.float32
    assert float(jnp.max(jnp.abs(out_f32 - ref_f32))) < 1e-6
    assert tgt is None

    # Case 2: plain cast float32 -> bfloat16 (scale=False) via Pallas.
    x_f32 = jax.random.normal(k1, (2, 4, 16, 16), dtype=jnp.float32)
    out_bf16, _ = ToDtype(jnp.bfloat16, scale=False, use_pallas=True)(x_f32)
    out_bf16 = jax.block_until_ready(out_bf16)
    assert out_bf16.dtype == jnp.bfloat16 and out_bf16.shape == (2, 4, 16, 16)
    assert float(jnp.max(jnp.abs(out_bf16.astype(jnp.float32) - x_f32))) < 2e-2

    # Case 3: total not a multiple of 128 -> pad-free full-extent-lane view
    # (cols=3267 divisor, ~98% lane utilization, no jnp.pad / slice).
    x_odd = jax.random.randint(k2, (2, 3, 33, 33), 0, 256, dtype=jnp.int32).astype(
        jnp.uint8
    )
    out_odd, _ = ToDtype(jnp.float32, scale=True, use_pallas=True)(x_odd)
    out_odd = jax.block_until_ready(out_odd)
    assert out_odd.shape == (2, 3, 33, 33) and out_odd.dtype == jnp.float32
    assert float(jnp.max(jnp.abs(out_odd - x_odd.astype(jnp.float32) / 255.0))) < 1e-6

    # Case 4: larger input -> multi-step tiled grid (incl. uneven last block).
    x_big = jax.random.randint(k0, (2, 4, 288, 288), 0, 256, dtype=jnp.int32).astype(
        jnp.uint8
    )
    out_big, _ = ToDtype(jnp.float32, scale=True, use_pallas=True)(x_big)
    out_big = jax.block_until_ready(out_big)
    assert float(jnp.max(jnp.abs(out_big - x_big.astype(jnp.float32) / 255.0))) < 1e-6

    # Case 5: auto heuristic on a tiny tensor -> fused jnp fallback path.
    out_small, _ = ToDtype(jnp.float32, scale=True)(x_u8)
    out_small = jax.block_until_ready(out_small)
    assert float(jnp.max(jnp.abs(out_small - ref_f32))) < 1e-6

    # Case 6: identity conversion returns the input unchanged (no work).
    out_id, _ = ToDtype(jnp.float32, scale=False)(x_f32)
    assert out_id is x_f32

    # Case 7: element count with no usable divisor (101*103) -> pad fallback.
    x_prm = jax.random.randint(k1, (1, 1, 101, 103), 0, 256, dtype=jnp.int32).astype(
        jnp.uint8
    )
    out_prm, _ = ToDtype(jnp.float32, scale=True, use_pallas=True)(x_prm)
    out_prm = jax.block_until_ready(out_prm)
    assert out_prm.shape == (1, 1, 101, 103) and out_prm.dtype == jnp.float32
    assert float(jnp.max(jnp.abs(out_prm - x_prm.astype(jnp.float32) / 255.0))) < 1e-6

    print("KERNEL_OK")
</pallas_src>

<mosaic_0001>
module attributes {stable_mosaic.version = 11 : i64} {
  func.func @_cast_scale_kernel(%arg0: i32, %arg1: memref<2x1024xi8, #tpu.memory_space<vmem>>, %arg2: memref<2x1024xf32, #tpu.memory_space<vmem>>) attributes {dimension_semantics = [#tpu.dimension_semantics<parallel>], iteration_bounds = array<i64: 1>, scalar_prefetch = 0 : i64, scratch_operands = 0 : i64, tpu.core_type = #tpu.core_type<tc>, window_params = [{transform_indices = @transform_0, window_bounds = array<i64: 2, 1024>}, {transform_indices = @transform_1, window_bounds = array<i64: 2, 1024>}]} {
    %c0 = arith.constant 0 : index
    %c0_0 = arith.constant 0 : index
    %0 = vector.load %arg1[%c0, %c0_0] : memref<2x1024xi8, #tpu.memory_space<vmem>>, vector<2x1024xi8>
    %1 = arith.uitofp %0 : vector<2x1024xi8> to vector<2x1024xf32>
    %cst = arith.constant 0.00392156886 : f32
    %2 = vector.broadcast %cst : f32 to vector<2x1024xf32>
    %3 = arith.mulf %1, %2 : vector<2x1024xf32>
    %c0_1 = arith.constant 0 : index
    %c0_2 = arith.constant 0 : index
    %4 = vector.load %arg2[%c0_1, %c0_2] : memref<2x1024xf32, #tpu.memory_space<vmem>>, vector<2x1024xf32>
    tpu.vector_store %arg2[%c0_1, %c0_2], %3 {strides = array<i32>} : memref<2x1024xf32, #tpu.memory_space<vmem>>, vector<2x1024xf32>,
    return
  }
  func.func @transform_0(%arg0: i32) -> (i32, i32) {
    %c0_i32 = arith.constant 0 : i32
    %c0_i32_0 = arith.constant 0 : i32
    return %arg0, %c0_i32 : i32, i32
  }
  func.func @transform_1(%arg0: i32) -> (i32, i32) {
    %c0_i32 = arith.constant 0 : i32
    %c0_i32_0 = arith.constant 0 : i32
    return %arg0, %c0_i32 : i32, i32
  }
}

</mosaic_0001>

<bundles_post_ra>
// kernel: tpu_custom_call.1
= control target key start
LH: loop header
LB: loop body
LE: loop exit
PB: predicated region body
PF: predicated region fallthrough
CT: control target
= control target key end

     0   :  { %6 = vsyncpa [#allocation3], 0  ;;  %s179_s0 = inlined_call_operand.hbm [shape: u8[2,1024], index: 0, kind: input, shape index: {}]   ;;  %s180_s1 = inlined_call_operand.hbm [shape: f32[2,1024], index: 1, kind: output, shape index: {}]  }
   0x1   :  { %7 = vsyncpa [#allocation4], 0  ;;  %s142_s6 = smov [#allocation2]   ;;  %s94_s10 = scalar_lea.hbm %s179_s0, 128 }
   0x2   :  { %s14_s7 = sshll.u32 %s142_s6, 4  ;;  %p95_p0 = scmp.ne.s32.totalorder %s179_s0, %s94_s10  ;;  %s15_s7 = int_to_ptr.vmem [resolvable:$true] %s14_s7 }
   0x3   :  { %p98_p1 = scmp.lt.u32.totalorder %s94_s10, %s179_s0 }
   0x5   :  { %p100_p2 = pnand %p98_p1, %p95_p0 }
   0x7   :  { %103 = shalt.err (!%p100_p2)
}
   0x8   :  { %s104_s15 = scalar_lea.vmem %s15_s7, 128  ;;  %p109_p4 = scmp.lt.s32.totalorder %s15_s7, %s15_s7 }
   0x9   :  { %p105_p3 = scmp.ne.s32.totalorder %s15_s7, %s104_s15  ;;  %p110_p5 = scmp.lt.s32.totalorder %s104_s15, %s104_s15 }
   0xb   :  { %p111_p6 = por %p110_p5, %p109_p4 }
   0xd   :  { %p112_p7 = pnand %p111_p6, %p105_p3 }
   0xf   :  { %115 = shalt.err (!%p112_p7)
}
  0x10   :  { %17 = dma.hbm_to_vmem [thread:$0]  %s179_s0, 128, %s15_s7, [#allocation3]  }
  0x11   :  { %138 = dma.done.wait [#allocation3], 128  }
  0x12   :  { %139 = vsyncadd [#allocation3], 4294967168  ;;  %v143_v0 = vmov 1983009808   ;;  %v45_v2 = vlaneseq  ;;  %v21_v3 = vld [vmem:[#allocation2] sm:$0xff]  ;;  %s144_s0 = smov [#allocation5]  }
  0x13   :  { %v43_v1 = vunpack.c.l.s4 %v143_v0  ;;  %v22_v6 = vunpack.c.0.s8 %v21_v3  ;;  %v23_v7 = vunpack.c.1.s8 %v21_v3  ;;  %v24_v8 = vunpack.c.2.s8 %v21_v3  ;;  %s82_s18 = sshll.u32 %s144_s0, 4  ;;  %s83_s18 = int_to_ptr.vmem [resolvable:$true] %s82_s18 }
  0x14   :  { %v46_v5 = vshrl.u32 %v45_v2, 7  ;;  %v25_v9 = vunpack.c.3.s8 %v21_v3  ;;  %s116_s19 = scalar_lea.vmem %s83_s18, 256  ;;  %p121_p9 = scmp.lt.s32.totalorder %s83_s18, %s83_s18 }
  0x15   :  { %v44_v4 = vunpack.c.0.s8 %v43_v1  ;;  %v26_v10 = vand.u32 255, %v22_v6  ;;  %v27_v11 = vand.u32 255, %v23_v7  ;;  %v28_v12 = vand.u32 255, %v24_v8  ;;  %p117_p8 = scmp.ne.s32.totalorder %s83_s18, %s116_s19  ;;  %p122_p10 = scmp.lt.s32.totalorder %s116_s19, %s116_s19 }
  0x16   :  { %v29_v13 = vand.u32 255, %v25_v9 }
  0x17   :  { %v47_v14 = vsub.s32 %v44_v4, %v46_v5  ;;  %v30_v15 = vcvt.s32.f32 %v26_v10  ;;  %v31_v16 = vcvt.s32.f32 %v27_v11  ;;  %v32_v17 = vcvt.s32.f32 %v28_v12  ;;  %p123_p11 = por %p122_p10, %p121_p9 }
  0x18   :  { %v33_v18 = vcvt.s32.f32 %v29_v13 }
  0x19   :  { %v34_v19 = vmul.f32 0.003921569, %v30_v15  ;;  %v35_v20 = vmul.f32 0.003921569, %v31_v16  ;;  %v36_v21 = vmul.f32 0.003921569, %v32_v17  ;;  %p124_p12 = pnand %p123_p11, %p117_p8 }
  0x1a   :  { %v37_v22 = vmul.f32 0.003921569, %v33_v18 }
  0x1b   :  { %v48_v23 = vrot.slane %v34_v19, %v47_v14  ;;  %v55_v24 = vrot.slane %v35_v20, %v47_v14  ;;  %v63_v25 = vrot.slane %v36_v21, %v47_v14 }
  0x1c   :  { %v70_v26 = vrot.slane %v37_v22, %v47_v14 }
  0x1d   :  { %v56_v27 = vcombine.low %v48_v23, %v55_v24 }
  0x1e   :  { %v71_v28 = vcombine.low %v63_v25, %v70_v26 }
  0x1f   :  { %74 = vst [vmem:[#allocation5] sm:$0xff] %v56_v27 }
  0x20   :  { %75 = vst [vmem:[#allocation5 + $0x8] sm:$0xff] %v71_v28 }
  0x21   :  { %127 = shalt.err (!%p124_p12)
}
  0x22   :  { %s128_s22 = scalar_lea.hbm %s180_s1, 256 }
  0x23   :  { %p129_p13 = scmp.ne.s32.totalorder %s180_s1, %s128_s22  ;;  %p132_p0 = scmp.lt.u32.totalorder %s128_s22, %s180_s1 }
  0x25   :  { %p134_p1 = pnand %p132_p0, %p129_p13 }
  0x27   :  { %137 = shalt.err (!%p134_p1)
}
  0x28   :  { %85 = dma.vmem_to_hbm [thread:$0]  %s83_s18, 256, %s180_s1, [#allocation4]  }
  0x29   :  { %140 = dma.done.wait [#allocation4], 256  }
  0x2a   :  { %141 = vsyncadd [#allocation4], 4294967040 }
  0x2b   :  { %89 = vsyncpa [#allocation3], 1 }
  0x2c   :  { %90 = vsyncpa [#allocation4], 1 }

</bundles_post_ra>
